<compile_context>
chip_gen: v5e
topology: v5e:2x2
jax: 0.10.0
libtpu: 0.0.40
codegen_flags: <defaults>
</compile_context>

<pallas_src>
import functools

import jax
import jax.numpy as jnp
from jax import lax
from jax.experimental import pallas as pl
from jax.experimental.pallas import tpu as pltpu


def _round_up(x, m):
    return (x + m - 1) // m * m


# ----------------------------- Pallas kernel --------------------------------
def _qst_kernel(x_ref, wih_ref, whh_ref, b_ref, h0_ref,
                w1h_ref, w1c_ref, b1_ref, w2_ref, b2_ref,
                qout_ref, qfeat_ref,
                xw_sc, hseq_sc, *, seq_len, batch, hidden_size):
    T, B, H = seq_len, batch, hidden_size

    # ---- hoisted input projection: tanh(embed) then ONE (T*B,E)x(E,4H) matmul.
    x = jnp.tanh(x_ref[...].astype(jnp.float32))                    # (T*B, E)
    xw_sc[...] = (jnp.dot(x, wih_ref[...],
                          preferred_element_type=jnp.float32)
                  + b_ref[...])                                      # (T*B, 4H)

    whh = whh_ref[...]                                               # (H, 4H)
    h0 = h0_ref[...].astype(jnp.float32)                             # (B, H)

    # ---- sequential LSTM recurrence (PyTorch gate order i, f, g, o),
    # fully unrolled in-kernel; only h @ W_hh sits on the serial chain.
    def step(t, carry):
        h, c = carry
        row = pl.multiple_of(t * B, B)
        gates = (xw_sc[pl.ds(row, B), :]
                 + jnp.dot(h, whh, preferred_element_type=jnp.float32))  # (B, 4H)
        sig = jax.nn.sigmoid(gates)          # one full-vreg EUP pass
        th = jnp.tanh(gates)                 # one full-vreg EUP pass
        i_g = sig[:, 0:H]
        f_g = sig[:, H:2 * H]
        g_g = th[:, 2 * H:3 * H]
        o_g = sig[:, 3 * H:4 * H]
        c_new = f_g * c + i_g * g_g
        h_new = o_g * jnp.tanh(c_new)
        hseq_sc[pl.ds(row, B), :] = jnp.tanh(h_new)   # stash tanh(h_t) for fc2
        return h_new, c_new

    h_fin, c_fin = lax.fori_loop(0, T, step, (h0, h0), unroll=True)

    # ---- fc2 on all timesteps at once: (T*B, H) x (H, Vp), lane-dense store.
    qout_ref[...] = (jnp.dot(hseq_sc[...], w2_ref[...],
                             preferred_element_type=jnp.float32)
                     + b2_ref[...])

    # ---- fc1 on tanh(cat(h, c)) via split weight (no concat needed).
    qfeat_ref[...] = (jnp.dot(jnp.tanh(h_fin), w1h_ref[...],
                              preferred_element_type=jnp.float32)
                      + jnp.dot(jnp.tanh(c_fin), w1c_ref[...],
                                preferred_element_type=jnp.float32)
                      + b1_ref[...])


def qst_encoder_forward(question, image_embedding, params,
                        *, hidden_size, embed_size):
    """question: (B, T) int32; image_embedding: (B, hidden_size) float32."""
    B, T = question.shape
    V, E = params["embedding"].shape
    H = hidden_size

    B_pad = _round_up(max(B, 8), 8)          # sublane-aligned batch
    V_pad = _round_up(V, 128)                # lane-dense fc2 output
    EM_pad = _round_up(embed_size, 128)      # lane-dense fc1 output

    # Glue: embedding gather + layout prep (plain JAX). Kernel applies the tanh.
    x_seq = params["embedding"][question].transpose(1, 0, 2)        # (T, B, E)
    x_seq = jnp.pad(x_seq, ((0, 0), (0, B_pad - B), (0, 0)))
    x_flat = x_seq.reshape(T * B_pad, E)                            # (T*Bp, E)

    h0 = jnp.pad(image_embedding.reshape(-1, H), ((0, B_pad - B), (0, 0)))

    wih = params["w_ih"]                                            # (E, 4H)
    whh = params["w_hh"]                                            # (H, 4H)
    b = (params["b_ih"] + params["b_hh"]).reshape(1, -1)            # (1, 4H)

    w1 = params["fc1_w"]                                            # (2H, embed)
    w1h = jnp.pad(w1[:H], ((0, 0), (0, EM_pad - embed_size)))
    w1c = jnp.pad(w1[H:], ((0, 0), (0, EM_pad - embed_size)))
    b1 = jnp.pad(params["fc1_b"], (0, EM_pad - embed_size)).reshape(1, -1)

    w2 = jnp.pad(params["fc2_w"], ((0, 0), (0, V_pad - V)))         # (H, Vp)
    b2 = jnp.pad(params["fc2_b"], (0, V_pad - V)).reshape(1, -1)

    kernel = functools.partial(_qst_kernel, seq_len=T, batch=B_pad,
                               hidden_size=H)

    # Single invocation: every operand is a whole-array VMEM block (weights are
    # loaded exactly once -- no per-step double-buffering needed).
    qout_flat, qfeat_pad = pl.pallas_call(
        kernel,
        out_shape=(
            jax.ShapeDtypeStruct((T * B_pad, V_pad), jnp.float32),
            jax.ShapeDtypeStruct((B_pad, EM_pad), jnp.float32),
        ),
        scratch_shapes=[
            pltpu.VMEM((T * B_pad, 4 * H), jnp.float32),   # hoisted x @ W_ih + b
            pltpu.VMEM((T * B_pad, H), jnp.float32),       # tanh(h_t) per step
        ],
    )(x_flat, wih, whh, b, h0, w1h, w1c, b1, w2, b2)

    qst_out = (qout_flat.reshape(T, B_pad, V_pad)[:, :B, :V]
               .transpose(1, 0, 2))                                  # (B, T, V)
    qst_feature = qfeat_pad[:B, :embed_size]                         # (B, embed)
    return qst_feature, qst_out


# ------------------------- pure-JAX reference (check) ------------------------
def qst_encoder_reference(question, image_embedding, params,
                          *, hidden_size, embed_size):
    H = hidden_size
    emb = params["embedding"][question]                              # (B, T, E)
    x = jnp.tanh(emb).transpose(1, 0, 2)                             # (T, B, E)
    h0 = image_embedding.reshape(1, -1, H)[0]
    b = params["b_ih"] + params["b_hh"]

    def step(carry, x_t):
        h, c = carry
        gates = x_t @ params["w_ih"] + h @ params["w_hh"] + b
        i = jax.nn.sigmoid(gates[:, :H])
        f = jax.nn.sigmoid(gates[:, H:2 * H])
        g = jnp.tanh(gates[:, 2 * H:3 * H])
        o = jax.nn.sigmoid(gates[:, 3 * H:4 * H])
        c = f * c + i * g
        h = o * jnp.tanh(c)
        return (h, c), h

    (h, c), outs = lax.scan(step, (h0, h0), x)
    qfeat = jnp.tanh(jnp.concatenate([h, c], -1)) @ params["fc1_w"] + params["fc1_b"]
    qout = jnp.tanh(outs) @ params["fc2_w"] + params["fc2_b"]        # (T, B, V)
    return qfeat, qout.transpose(1, 0, 2)


# --------------------------------- main --------------------------------------
if __name__ == "__main__":
    # Small, module-consistent sizes.
    qst_vocab_size = 50
    word_embed_size = 16
    embed_size = 24
    num_layers = 1          # forward() only works with num_layers=1 hidden init
    hidden_size = 32
    batch = 2
    seq_len = 8

    key = jax.random.PRNGKey(0)
    ks = jax.random.split(key, 10)

    params = {
        "embedding": jax.random.normal(ks[0], (qst_vocab_size, word_embed_size),
                                       jnp.float32) * 0.1,
        "w_ih": jax.random.normal(ks[1], (word_embed_size, 4 * hidden_size),
                                  jnp.float32) * 0.1,
        "w_hh": jax.random.normal(ks[2], (hidden_size, 4 * hidden_size),
                                  jnp.float32) * 0.1,
        "b_ih": jax.random.normal(ks[3], (4 * hidden_size,), jnp.float32) * 0.1,
        "b_hh": jax.random.normal(ks[4], (4 * hidden_size,), jnp.float32) * 0.1,
        # fc1: (embed_size, 2H) in torch; stored transposed (2H, embed_size).
        "fc1_w": jax.random.normal(ks[5], (2 * hidden_size, embed_size),
                                   jnp.float32) * 0.1,
        "fc1_b": jnp.zeros((embed_size,), jnp.float32),
        # fc2: (vocab, H) in torch; stored transposed (H, vocab).
        "fc2_w": jax.random.normal(ks[6], (hidden_size, qst_vocab_size),
                                   jnp.float32) * 0.1,
        "fc2_b": jnp.zeros((qst_vocab_size,), jnp.float32),
    }

    question = jax.random.randint(ks[7], (batch, seq_len), 0, qst_vocab_size,
                                  dtype=jnp.int32)
    image_embedding = jax.random.normal(ks[8], (batch, hidden_size), jnp.float32)

    qfeat, qout = qst_encoder_forward(question, image_embedding, params,
                                      hidden_size=hidden_size,
                                      embed_size=embed_size)
    jax.block_until_ready((qfeat, qout))

    qfeat_ref, qout_ref = qst_encoder_reference(question, image_embedding, params,
                                                hidden_size=hidden_size,
                                                embed_size=embed_size)
    assert qfeat.shape == (batch, embed_size)
    assert qout.shape == (batch, seq_len, qst_vocab_size)
    assert jnp.allclose(qfeat, qfeat_ref, atol=1e-4, rtol=1e-4)
    assert jnp.allclose(qout, qout_ref, atol=1e-4, rtol=1e-4)

    print("KERNEL_OK")
</pallas_src>

<mosaic_0001>
module attributes {stable_mosaic.version = 11 : i64} {
  func.func @_qst_kernel(%arg0: memref<64x16xf32, #tpu.memory_space<vmem>>, %arg1: memref<16x128xf32, #tpu.memory_space<vmem>>, %arg2: memref<32x128xf32, #tpu.memory_space<vmem>>, %arg3: memref<1x128xf32, #tpu.memory_space<vmem>>, %arg4: memref<8x32xf32, #tpu.memory_space<vmem>>, %arg5: memref<32x128xf32, #tpu.memory_space<vmem>>, %arg6: memref<32x128xf32, #tpu.memory_space<vmem>>, %arg7: memref<1x128xf32, #tpu.memory_space<vmem>>, %arg8: memref<32x128xf32, #tpu.memory_space<vmem>>, %arg9: memref<1x128xf32, #tpu.memory_space<vmem>>, %arg10: memref<64x128xf32, #tpu.memory_space<vmem>>, %arg11: memref<8x128xf32, #tpu.memory_space<vmem>>, %arg12: memref<64x128xf32, #tpu.memory_space<vmem>>, %arg13: memref<64x32xf32, #tpu.memory_space<vmem>>) attributes {dimension_semantics = [], scalar_prefetch = 0 : i64, scratch_operands = 2 : i64, tpu.core_type = #tpu.core_type<tc>} {
    %c0 = arith.constant 0 : index
    %c0_0 = arith.constant 0 : index
    %0 = vector.load %arg0[%c0, %c0_0] : memref<64x16xf32, #tpu.memory_space<vmem>>, vector<64x16xf32>
    %1 = math.tanh %0 : vector<64x16xf32>
    %c0_1 = arith.constant 0 : index
    %c0_2 = arith.constant 0 : index
    %2 = vector.load %arg1[%c0_1, %c0_2] : memref<16x128xf32, #tpu.memory_space<vmem>>, vector<16x128xf32>
    %cst = arith.constant dense<0.000000e+00> : vector<64x128xf32>
    %3 = tpu.matmul %1, %2, %cst {dimension_numbers = #tpu.dot_dimension_numbers<[1], [0], [0], [1], [0, 0, 1, 1], [], []>} : vector<64x16xf32>, vector<16x128xf32>, vector<64x128xf32> -> vector<64x128xf32>
    %c0_3 = arith.constant 0 : index
    %c0_4 = arith.constant 0 : index
    %4 = vector.load %arg3[%c0_3, %c0_4] : memref<1x128xf32, #tpu.memory_space<vmem>>, vector<1x128xf32>
    %5 = vector.broadcast %4 : vector<1x128xf32> to vector<64x128xf32>
    %6 = arith.addf %3, %5 : vector<64x128xf32>
    %c0_5 = arith.constant 0 : index
    %c0_6 = arith.constant 0 : index
    %7 = vector.load %arg12[%c0_5, %c0_6] : memref<64x128xf32, #tpu.memory_space<vmem>>, vector<64x128xf32>
    tpu.vector_store %arg12[%c0_5, %c0_6], %6 {strides = array<i32>} : memref<64x128xf32, #tpu.memory_space<vmem>>, vector<64x128xf32>,
    %c0_7 = arith.constant 0 : index
    %c0_8 = arith.constant 0 : index
    %8 = vector.load %arg2[%c0_7, %c0_8] : memref<32x128xf32, #tpu.memory_space<vmem>>, vector<32x128xf32>
    %c0_9 = arith.constant 0 : index
    %c0_10 = arith.constant 0 : index
    %9 = vector.load %arg4[%c0_9, %c0_10] : memref<8x32xf32, #tpu.memory_space<vmem>>, vector<8x32xf32>
    %c0_i32 = arith.constant 0 : i32
    %c8_i32 = arith.constant 8 : i32
    %10 = arith.muli %c0_i32, %c8_i32 : i32
    %11 = tpu.assume_multiple %10, 8 : i32
    %12 = arith.index_cast %11 : i32 to index
    %c0_11 = arith.constant 0 : index
    %13 = vector.load %arg12[%12, %c0_11] : memref<64x128xf32, #tpu.memory_space<vmem>>, vector<8x128xf32>
    %cst_12 = arith.constant dense<0.000000e+00> : vector<8x128xf32>
    %14 = tpu.matmul %9, %8, %cst_12 {dimension_numbers = #tpu.dot_dimension_numbers<[1], [0], [0], [1], [0, 0, 1, 1], [], []>} : vector<8x32xf32>, vector<32x128xf32>, vector<8x128xf32> -> vector<8x128xf32>
    %15 = arith.addf %13, %14 : vector<8x128xf32>
    %16 = arith.negf %15 : vector<8x128xf32>
    %17 = math.exp %16 : vector<8x128xf32>
    %cst_13 = arith.constant 1.000000e+00 : f32
    %18 = vector.broadcast %cst_13 : f32 to vector<8x128xf32>
    %19 = arith.addf %18, %17 : vector<8x128xf32>
    %20 = arith.divf %18, %19 : vector<8x128xf32>
    %21 = math.tanh %15 : vector<8x128xf32>
    %22 = vector.extract_strided_slice %20 {offsets = [0, 0], sizes = [8, 32], strides = [1, 1]} : vector<8x128xf32> to vector<8x32xf32>
    %23 = vector.extract_strided_slice %20 {offsets = [0, 32], sizes = [8, 32], strides = [1, 1]} : vector<8x128xf32> to vector<8x32xf32>
    %24 = vector.extract_strided_slice %21 {offsets = [0, 64], sizes = [8, 32], strides = [1, 1]} : vector<8x128xf32> to vector<8x32xf32>
    %25 = vector.extract_strided_slice %20 {offsets = [0, 96], sizes = [8, 32], strides = [1, 1]} : vector<8x128xf32> to vector<8x32xf32>
    %26 = arith.mulf %23, %9 : vector<8x32xf32>
    %27 = arith.mulf %22, %24 : vector<8x32xf32>
    %28 = arith.addf %26, %27 : vector<8x32xf32>
    %29 = math.tanh %28 : vector<8x32xf32>
    %30 = arith.mulf %25, %29 : vector<8x32xf32>
    %31 = math.tanh %30 : vector<8x32xf32>
    %32 = arith.index_cast %11 : i32 to index
    %c0_14 = arith.constant 0 : index
    %33 = vector.load %arg13[%32, %c0_14] : memref<64x32xf32, #tpu.memory_space<vmem>>, vector<8x32xf32>
    tpu.vector_store %arg13[%32, %c0_14], %31 {strides = array<i32>} : memref<64x32xf32, #tpu.memory_space<vmem>>, vector<8x32xf32>,
    %c1_i32 = arith.constant 1 : i32
    %c8_i32_15 = arith.constant 8 : i32
    %34 = arith.muli %c1_i32, %c8_i32_15 : i32
    %35 = tpu.assume_multiple %34, 8 : i32
    %36 = arith.index_cast %35 : i32 to index
    %c0_16 = arith.constant 0 : index
    %37 = vector.load %arg12[%36, %c0_16] : memref<64x128xf32, #tpu.memory_space<vmem>>, vector<8x128xf32>
    %cst_17 = arith.constant dense<0.000000e+00> : vector<8x128xf32>
    %38 = tpu.matmul %30, %8, %cst_17 {dimension_numbers = #tpu.dot_dimension_numbers<[1], [0], [0], [1], [0, 0, 1, 1], [], []>} : vector<8x32xf32>, vector<32x128xf32>, vector<8x128xf32> -> vector<8x128xf32>
    %39 = arith.addf %37, %38 : vector<8x128xf32>
    %40 = arith.negf %39 : vector<8x128xf32>
    %41 = math.exp %40 : vector<8x128xf32>
    %cst_18 = arith.constant 1.000000e+00 : f32
    %42 = vector.broadcast %cst_18 : f32 to vector<8x128xf32>
    %43 = arith.addf %42, %41 : vector<8x128xf32>
    %44 = arith.divf %42, %43 : vector<8x128xf32>
    %45 = math.tanh %39 : vector<8x128xf32>
    %46 = vector.extract_strided_slice %44 {offsets = [0, 0], sizes = [8, 32], strides = [1, 1]} : vector<8x128xf32> to vector<8x32xf32>
    %47 = vector.extract_strided_slice %44 {offsets = [0, 32], sizes = [8, 32], strides = [1, 1]} : vector<8x128xf32> to vector<8x32xf32>
    %48 = vector.extract_strided_slice %45 {offsets = [0, 64], sizes = [8, 32], strides = [1, 1]} : vector<8x128xf32> to vector<8x32xf32>
    %49 = vector.extract_strided_slice %44 {offsets = [0, 96], sizes = [8, 32], strides = [1, 1]} : vector<8x128xf32> to vector<8x32xf32>
    %50 = arith.mulf %47, %28 : vector<8x32xf32>
    %51 = arith.mulf %46, %48 : vector<8x32xf32>
    %52 = arith.addf %50, %51 : vector<8x32xf32>
    %53 = math.tanh %52 : vector<8x32xf32>
    %54 = arith.mulf %49, %53 : vector<8x32xf32>
    %55 = math.tanh %54 : vector<8x32xf32>
    %56 = arith.index_cast %35 : i32 to index
    %c0_19 = arith.constant 0 : index
    %57 = vector.load %arg13[%56, %c0_19] : memref<64x32xf32, #tpu.memory_space<vmem>>, vector<8x32xf32>
    tpu.vector_store %arg13[%56, %c0_19], %55 {strides = array<i32>} : memref<64x32xf32, #tpu.memory_space<vmem>>, vector<8x32xf32>,
    %c2_i32 = arith.constant 2 : i32
    %c8_i32_20 = arith.constant 8 : i32
    %58 = arith.muli %c2_i32, %c8_i32_20 : i32
    %59 = tpu.assume_multiple %58, 8 : i32
    %60 = arith.index_cast %59 : i32 to index
    %c0_21 = arith.constant 0 : index
    %61 = vector.load %arg12[%60, %c0_21] : memref<64x128xf32, #tpu.memory_space<vmem>>, vector<8x128xf32>
    %cst_22 = arith.constant dense<0.000000e+00> : vector<8x128xf32>
    %62 = tpu.matmul %54, %8, %cst_22 {dimension_numbers = #tpu.dot_dimension_numbers<[1], [0], [0], [1], [0, 0, 1, 1], [], []>} : vector<8x32xf32>, vector<32x128xf32>, vector<8x128xf32> -> vector<8x128xf32>
    %63 = arith.addf %61, %62 : vector<8x128xf32>
    %64 = arith.negf %63 : vector<8x128xf32>
    %65 = math.exp %64 : vector<8x128xf32>
    %cst_23 = arith.constant 1.000000e+00 : f32
    %66 = vector.broadcast %cst_23 : f32 to vector<8x128xf32>
    %67 = arith.addf %66, %65 : vector<8x128xf32>
    %68 = arith.divf %66, %67 : vector<8x128xf32>
    %69 = math.tanh %63 : vector<8x128xf32>
    %70 = vector.extract_strided_slice %68 {offsets = [0, 0], sizes = [8, 32], strides = [1, 1]} : vector<8x128xf32> to vector<8x32xf32>
    %71 = vector.extract_strided_slice %68 {offsets = [0, 32], sizes = [8, 32], strides = [1, 1]} : vector<8x128xf32> to vector<8x32xf32>
    %72 = vector.extract_strided_slice %69 {offsets = [0, 64], sizes = [8, 32], strides = [1, 1]} : vector<8x128xf32> to vector<8x32xf32>
    %73 = vector.extract_strided_slice %68 {offsets = [0, 96], sizes = [8, 32], strides = [1, 1]} : vector<8x128xf32> to vector<8x32xf32>
    %74 = arith.mulf %71, %52 : vector<8x32xf32>
    %75 = arith.mulf %70, %72 : vector<8x32xf32>
    %76 = arith.addf %74, %75 : vector<8x32xf32>
    %77 = math.tanh %76 : vector<8x32xf32>
    %78 = arith.mulf %73, %77 : vector<8x32xf32>
    %79 = math.tanh %78 : vector<8x32xf32>
    %80 = arith.index_cast %59 : i32 to index
    %c0_24 = arith.constant 0 : index
    %81 = vector.load %arg13[%80, %c0_24] : memref<64x32xf32, #tpu.memory_space<vmem>>, vector<8x32xf32>
    tpu.vector_store %arg13[%80, %c0_24], %79 {strides = array<i32>} : memref<64x32xf32, #tpu.memory_space<vmem>>, vector<8x32xf32>,
    %c3_i32 = arith.constant 3 : i32
    %c8_i32_25 = arith.constant 8 : i32
    %82 = arith.muli %c3_i32, %c8_i32_25 : i32
    %83 = tpu.assume_multiple %82, 8 : i32
    %84 = arith.index_cast %83 : i32 to index
    %c0_26 = arith.constant 0 : index
    %85 = vector.load %arg12[%84, %c0_26] : memref<64x128xf32, #tpu.memory_space<vmem>>, vector<8x128xf32>
    %cst_27 = arith.constant dense<0.000000e+00> : vector<8x128xf32>
    %86 = tpu.matmul %78, %8, %cst_27 {dimension_numbers = #tpu.dot_dimension_numbers<[1], [0], [0], [1], [0, 0, 1, 1], [], []>} : vector<8x32xf32>, vector<32x128xf32>, vector<8x128xf32> -> vector<8x128xf32>
    %87 = arith.addf %85, %86 : vector<8x128xf32>
    %88 = arith.negf %87 : vector<8x128xf32>
    %89 = math.exp %88 : vector<8x128xf32>
    %cst_28 = arith.constant 1.000000e+00 : f32
    %90 = vector.broadcast %cst_28 : f32 to vector<8x128xf32>
    %91 = arith.addf %90, %89 : vector<8x128xf32>
    %92 = arith.divf %90, %91 : vector<8x128xf32>
    %93 = math.tanh %87 : vector<8x128xf32>
    %94 = vector.extract_strided_slice %92 {offsets = [0, 0], sizes = [8, 32], strides = [1, 1]} : vector<8x128xf32> to vector<8x32xf32>
    %95 = vector.extract_strided_slice %92 {offsets = [0, 32], sizes = [8, 32], strides = [1, 1]} : vector<8x128xf32> to vector<8x32xf32>
    %96 = vector.extract_strided_slice %93 {offsets = [0, 64], sizes = [8, 32], strides = [1, 1]} : vector<8x128xf32> to vector<8x32xf32>
    %97 = vector.extract_strided_slice %92 {offsets = [0, 96], sizes = [8, 32], strides = [1, 1]} : vector<8x128xf32> to vector<8x32xf32>
    %98 = arith.mulf %95, %76 : vector<8x32xf32>
    %99 = arith.mulf %94, %96 : vector<8x32xf32>
    %100 = arith.addf %98, %99 : vector<8x32xf32>
    %101 = math.tanh %100 : vector<8x32xf32>
    %102 = arith.mulf %97, %101 : vector<8x32xf32>
    %103 = math.tanh %102 : vector<8x32xf32>
    %104 = arith.index_cast %83 : i32 to index
    %c0_29 = arith.constant 0 : index
    %105 = vector.load %arg13[%104, %c0_29] : memref<64x32xf32, #tpu.memory_space<vmem>>, vector<8x32xf32>
    tpu.vector_store %arg13[%104, %c0_29], %103 {strides = array<i32>} : memref<64x32xf32, #tpu.memory_space<vmem>>, vector<8x32xf32>,
    %c4_i32 = arith.constant 4 : i32
    %c8_i32_30 = arith.constant 8 : i32
    %106 = arith.muli %c4_i32, %c8_i32_30 : i32
    %107 = tpu.assume_multiple %106, 8 : i32
    %108 = arith.index_cast %107 : i32 to index
    %c0_31 = arith.constant 0 : index
    %109 = vector.load %arg12[%108, %c0_31] : memref<64x128xf32, #tpu.memory_space<vmem>>, vector<8x128xf32>
    %cst_32 = arith.constant dense<0.000000e+00> : vector<8x128xf32>
    %110 = tpu.matmul %102, %8, %cst_32 {dimension_numbers = #tpu.dot_dimension_numbers<[1], [0], [0], [1], [0, 0, 1, 1], [], []>} : vector<8x32xf32>, vector<32x128xf32>, vector<8x128xf32> -> vector<8x128xf32>
    %111 = arith.addf %109, %110 : vector<8x128xf32>
    %112 = arith.negf %111 : vector<8x128xf32>
    %113 = math.exp %112 : vector<8x128xf32>
    %cst_33 = arith.constant 1.000000e+00 : f32
    %114 = vector.broadcast %cst_33 : f32 to vector<8x128xf32>
    %115 = arith.addf %114, %113 : vector<8x128xf32>
    %116 = arith.divf %114, %115 : vector<8x128xf32>
    %117 = math.tanh %111 : vector<8x128xf32>
    %118 = vector.extract_strided_slice %116 {offsets = [0, 0], sizes = [8, 32], strides = [1, 1]} : vector<8x128xf32> to vector<8x32xf32>
    %119 = vector.extract_strided_slice %116 {offsets = [0, 32], sizes = [8, 32], strides = [1, 1]} : vector<8x128xf32> to vector<8x32xf32>
    %120 = vector.extract_strided_slice %117 {offsets = [0, 64], sizes = [8, 32], strides = [1, 1]} : vector<8x128xf32> to vector<8x32xf32>
    %121 = vector.extract_strided_slice %116 {offsets = [0, 96], sizes = [8, 32], strides = [1, 1]} : vector<8x128xf32> to vector<8x32xf32>
    %122 = arith.mulf %119, %100 : vector<8x32xf32>
    %123 = arith.mulf %118, %120 : vector<8x32xf32>
    %124 = arith.addf %122, %123 : vector<8x32xf32>
    %125 = math.tanh %124 : vector<8x32xf32>
    %126 = arith.mulf %121, %125 : vector<8x32xf32>
    %127 = math.tanh %126 : vector<8x32xf32>
    %128 = arith.index_cast %107 : i32 to index
    %c0_34 = arith.constant 0 : index
    %129 = vector.load %arg13[%128, %c0_34] : memref<64x32xf32, #tpu.memory_space<vmem>>, vector<8x32xf32>
    tpu.vector_store %arg13[%128, %c0_34], %127 {strides = array<i32>} : memref<64x32xf32, #tpu.memory_space<vmem>>, vector<8x32xf32>,
    %c5_i32 = arith.constant 5 : i32
    %c8_i32_35 = arith.constant 8 : i32
    %130 = arith.muli %c5_i32, %c8_i32_35 : i32
    %131 = tpu.assume_multiple %130, 8 : i32
    %132 = arith.index_cast %131 : i32 to index
    %c0_36 = arith.constant 0 : index
    %133 = vector.load %arg12[%132, %c0_36] : memref<64x128xf32, #tpu.memory_space<vmem>>, vector<8x128xf32>
    %cst_37 = arith.constant dense<0.000000e+00> : vector<8x128xf32>
    %134 = tpu.matmul %126, %8, %cst_37 {dimension_numbers = #tpu.dot_dimension_numbers<[1], [0], [0], [1], [0, 0, 1, 1], [], []>} : vector<8x32xf32>, vector<32x128xf32>, vector<8x128xf32> -> vector<8x128xf32>
    %135 = arith.addf %133, %134 : vector<8x128xf32>
    %136 = arith.negf %135 : vector<8x128xf32>
    %137 = math.exp %136 : vector<8x128xf32>
    %cst_38 = arith.constant 1.000000e+00 : f32
    %138 = vector.broadcast %cst_38 : f32 to vector<8x128xf32>
    %139 = arith.addf %138, %137 : vector<8x128xf32>
    %140 = arith.divf %138, %139 : vector<8x128xf32>
    %141 = math.tanh %135 : vector<8x128xf32>
    %142 = vector.extract_strided_slice %140 {offsets = [0, 0], sizes = [8, 32], strides = [1, 1]} : vector<8x128xf32> to vector<8x32xf32>
    %143 = vector.extract_strided_slice %140 {offsets = [0, 32], sizes = [8, 32], strides = [1, 1]} : vector<8x128xf32> to vector<8x32xf32>
    %144 = vector.extract_strided_slice %141 {offsets = [0, 64], sizes = [8, 32], strides = [1, 1]} : vector<8x128xf32> to vector<8x32xf32>
    %145 = vector.extract_strided_slice %140 {offsets = [0, 96], sizes = [8, 32], strides = [1, 1]} : vector<8x128xf32> to vector<8x32xf32>
    %146 = arith.mulf %143, %124 : vector<8x32xf32>
    %147 = arith.mulf %142, %144 : vector<8x32xf32>
    %148 = arith.addf %146, %147 : vector<8x32xf32>
    %149 = math.tanh %148 : vector<8x32xf32>
    %150 = arith.mulf %145, %149 : vector<8x32xf32>
    %151 = math.tanh %150 : vector<8x32xf32>
    %152 = arith.index_cast %131 : i32 to index
    %c0_39 = arith.constant 0 : index
    %153 = vector.load %arg13[%152, %c0_39] : memref<64x32xf32, #tpu.memory_space<vmem>>, vector<8x32xf32>
    tpu.vector_store %arg13[%152, %c0_39], %151 {strides = array<i32>} : memref<64x32xf32, #tpu.memory_space<vmem>>, vector<8x32xf32>,
    %c6_i32 = arith.constant 6 : i32
    %c8_i32_40 = arith.constant 8 : i32
    %154 = arith.muli %c6_i32, %c8_i32_40 : i32
    %155 = tpu.assume_multiple %154, 8 : i32
    %156 = arith.index_cast %155 : i32 to index
    %c0_41 = arith.constant 0 : index
    %157 = vector.load %arg12[%156, %c0_41] : memref<64x128xf32, #tpu.memory_space<vmem>>, vector<8x128xf32>
    %cst_42 = arith.constant dense<0.000000e+00> : vector<8x128xf32>
    %158 = tpu.matmul %150, %8, %cst_42 {dimension_numbers = #tpu.dot_dimension_numbers<[1], [0], [0], [1], [0, 0, 1, 1], [], []>} : vector<8x32xf32>, vector<32x128xf32>, vector<8x128xf32> -> vector<8x128xf32>
    %159 = arith.addf %157, %158 : vector<8x128xf32>
    %160 = arith.negf %159 : vector<8x128xf32>
    %161 = math.exp %160 : vector<8x128xf32>
    %cst_43 = arith.constant 1.000000e+00 : f32
    %162 = vector.broadcast %cst_43 : f32 to vector<8x128xf32>
    %163 = arith.addf %162, %161 : vector<8x128xf32>
    %164 = arith.divf %162, %163 : vector<8x128xf32>
    %165 = math.tanh %159 : vector<8x128xf32>
    %166 = vector.extract_strided_slice %164 {offsets = [0, 0], sizes = [8, 32], strides = [1, 1]} : vector<8x128xf32> to vector<8x32xf32>
    %167 = vector.extract_strided_slice %164 {offsets = [0, 32], sizes = [8, 32], strides = [1, 1]} : vector<8x128xf32> to vector<8x32xf32>
    %168 = vector.extract_strided_slice %165 {offsets = [0, 64], sizes = [8, 32], strides = [1, 1]} : vector<8x128xf32> to vector<8x32xf32>
    %169 = vector.extract_strided_slice %164 {offsets = [0, 96], sizes = [8, 32], strides = [1, 1]} : vector<8x128xf32> to vector<8x32xf32>
    %170 = arith.mulf %167, %148 : vector<8x32xf32>
    %171 = arith.mulf %166, %168 : vector<8x32xf32>
    %172 = arith.addf %170, %171 : vector<8x32xf32>
    %173 = math.tanh %172 : vector<8x32xf32>
    %174 = arith.mulf %169, %173 : vector<8x32xf32>
    %175 = math.tanh %174 : vector<8x32xf32>
    %176 = arith.index_cast %155 : i32 to index
    %c0_44 = arith.constant 0 : index
    %177 = vector.load %arg13[%176, %c0_44] : memref<64x32xf32, #tpu.memory_space<vmem>>, vector<8x32xf32>
    tpu.vector_store %arg13[%176, %c0_44], %175 {strides = array<i32>} : memref<64x32xf32, #tpu.memory_space<vmem>>, vector<8x32xf32>,
    %c7_i32 = arith.constant 7 : i32
    %c8_i32_45 = arith.constant 8 : i32
    %178 = arith.muli %c7_i32, %c8_i32_45 : i32
    %179 = tpu.assume_multiple %178, 8 : i32
    %180 = arith.index_cast %179 : i32 to index
    %c0_46 = arith.constant 0 : index
    %181 = vector.load %arg12[%180, %c0_46] : memref<64x128xf32, #tpu.memory_space<vmem>>, vector<8x128xf32>
    %cst_47 = arith.constant dense<0.000000e+00> : vector<8x128xf32>
    %182 = tpu.matmul %174, %8, %cst_47 {dimension_numbers = #tpu.dot_dimension_numbers<[1], [0], [0], [1], [0, 0, 1, 1], [], []>} : vector<8x32xf32>, vector<32x128xf32>, vector<8x128xf32> -> vector<8x128xf32>
    %183 = arith.addf %181, %182 : vector<8x128xf32>
    %184 = arith.negf %183 : vector<8x128xf32>
    %185 = math.exp %184 : vector<8x128xf32>
    %cst_48 = arith.constant 1.000000e+00 : f32
    %186 = vector.broadcast %cst_48 : f32 to vector<8x128xf32>
    %187 = arith.addf %186, %185 : vector<8x128xf32>
    %188 = arith.divf %186, %187 : vector<8x128xf32>
    %189 = math.tanh %183 : vector<8x128xf32>
    %190 = vector.extract_strided_slice %188 {offsets = [0, 0], sizes = [8, 32], strides = [1, 1]} : vector<8x128xf32> to vector<8x32xf32>
    %191 = vector.extract_strided_slice %188 {offsets = [0, 32], sizes = [8, 32], strides = [1, 1]} : vector<8x128xf32> to vector<8x32xf32>
    %192 = vector.extract_strided_slice %189 {offsets = [0, 64], sizes = [8, 32], strides = [1, 1]} : vector<8x128xf32> to vector<8x32xf32>
    %193 = vector.extract_strided_slice %188 {offsets = [0, 96], sizes = [8, 32], strides = [1, 1]} : vector<8x128xf32> to vector<8x32xf32>
    %194 = arith.mulf %191, %172 : vector<8x32xf32>
    %195 = arith.mulf %190, %192 : vector<8x32xf32>
    %196 = arith.addf %194, %195 : vector<8x32xf32>
    %197 = math.tanh %196 : vector<8x32xf32>
    %198 = arith.mulf %193, %197 : vector<8x32xf32>
    %199 = math.tanh %198 : vector<8x32xf32>
    %200 = arith.index_cast %179 : i32 to index
    %c0_49 = arith.constant 0 : index
    %201 = vector.load %arg13[%200, %c0_49] : memref<64x32xf32, #tpu.memory_space<vmem>>, vector<8x32xf32>
    tpu.vector_store %arg13[%200, %c0_49], %199 {strides = array<i32>} : memref<64x32xf32, #tpu.memory_space<vmem>>, vector<8x32xf32>,
    %c8_i32_50 = arith.constant 8 : i32
    %c0_51 = arith.constant 0 : index
    %c0_52 = arith.constant 0 : index
    %202 = vector.load %arg13[%c0_51, %c0_52] : memref<64x32xf32, #tpu.memory_space<vmem>>, vector<64x32xf32>
    %c0_53 = arith.constant 0 : index
    %c0_54 = arith.constant 0 : index
    %203 = vector.load %arg8[%c0_53, %c0_54] : memref<32x128xf32, #tpu.memory_space<vmem>>, vector<32x128xf32>
    %cst_55 = arith.constant dense<0.000000e+00> : vector<64x128xf32>
    %204 = tpu.matmul %202, %203, %cst_55 {dimension_numbers = #tpu.dot_dimension_numbers<[1], [0], [0], [1], [0, 0, 1, 1], [], []>} : vector<64x32xf32>, vector<32x128xf32>, vector<64x128xf32> -> vector<64x128xf32>
    %c0_56 = arith.constant 0 : index
    %c0_57 = arith.constant 0 : index
    %205 = vector.load %arg9[%c0_56, %c0_57] : memref<1x128xf32, #tpu.memory_space<vmem>>, vector<1x128xf32>
    %206 = vector.broadcast %205 : vector<1x128xf32> to vector<64x128xf32>
    %207 = arith.addf %204, %206 : vector<64x128xf32>
    %c0_58 = arith.constant 0 : index
    %c0_59 = arith.constant 0 : index
    %208 = vector.load %arg10[%c0_58, %c0_59] : memref<64x128xf32, #tpu.memory_space<vmem>>, vector<64x128xf32>
    tpu.vector_store %arg10[%c0_58, %c0_59], %207 {strides = array<i32>} : memref<64x128xf32, #tpu.memory_space<vmem>>, vector<64x128xf32>,
    %209 = math.tanh %198 : vector<8x32xf32>
    %c0_60 = arith.constant 0 : index
    %c0_61 = arith.constant 0 : index
    %210 = vector.load %arg5[%c0_60, %c0_61] : memref<32x128xf32, #tpu.memory_space<vmem>>, vector<32x128xf32>
    %cst_62 = arith.constant dense<0.000000e+00> : vector<8x128xf32>
    %211 = tpu.matmul %209, %210, %cst_62 {dimension_numbers = #tpu.dot_dimension_numbers<[1], [0], [0], [1], [0, 0, 1, 1], [], []>} : vector<8x32xf32>, vector<32x128xf32>, vector<8x128xf32> -> vector<8x128xf32>
    %212 = math.tanh %196 : vector<8x32xf32>
    %c0_63 = arith.constant 0 : index
    %c0_64 = arith.constant 0 : index
    %213 = vector.load %arg6[%c0_63, %c0_64] : memref<32x128xf32, #tpu.memory_space<vmem>>, vector<32x128xf32>
    %cst_65 = arith.constant dense<0.000000e+00> : vector<8x128xf32>
    %214 = tpu.matmul %212, %213, %cst_65 {dimension_numbers = #tpu.dot_dimension_numbers<[1], [0], [0], [1], [0, 0, 1, 1], [], []>} : vector<8x32xf32>, vector<32x128xf32>, vector<8x128xf32> -> vector<8x128xf32>
    %215 = arith.addf %211, %214 : vector<8x128xf32>
    %c0_66 = arith.constant 0 : index
    %c0_67 = arith.constant 0 : index
    %216 = vector.load %arg7[%c0_66, %c0_67] : memref<1x128xf32, #tpu.memory_space<vmem>>, vector<1x128xf32>
    %217 = vector.broadcast %216 : vector<1x128xf32> to vector<8x128xf32>
    %218 = arith.addf %215, %217 : vector<8x128xf32>
    %c0_68 = arith.constant 0 : index
    %c0_69 = arith.constant 0 : index
    %219 = vector.load %arg11[%c0_68, %c0_69] : memref<8x128xf32, #tpu.memory_space<vmem>>, vector<8x128xf32>
    tpu.vector_store %arg11[%c0_68, %c0_69], %218 {strides = array<i32>} : memref<8x128xf32, #tpu.memory_space<vmem>>, vector<8x128xf32>,
    return
  }
}

</mosaic_0001>

<bundles_post_ra>
// kernel: tpu_custom_call.1
= control target key start
LH: loop header
LB: loop body
LE: loop exit
PB: predicated region body
PF: predicated region fallthrough
CT: control target
= control target key end

     0   :  { %17 = vsyncpa [#allocation5], 0  ;;  %s1545_s0 = inlined_call_operand.vmem [shape: f32[64,16], index: 0, kind: input, shape index: {}]   ;;  %s1546_s1 = inlined_call_operand.vmem [shape: f32[16,128], index: 1, kind: input, shape index: {}]   ;;  %s1547_s2 = inlined_call_operand.vmem [shape: f32[32,128], index: 2, kind: input, shape index: {}]   ;;  %s1548_s3 = inlined_call_operand.vmem [shape: f32[1,128], index: 3, kind: input, shape index: {}]   ;;  %s1549_s4 = inlined_call_operand.hbm [shape: f32[8,32], index: 4, kind: input, shape index: {}]   ;;  %s1550_s5 = inlined_call_operand.vmem [shape: f32[32,128], index: 5, kind: input, shape index: {}]   ;;  %s1551_s6 = inlined_call_operand.hbm [shape: f32[32,128], index: 6, kind: input, shape index: {}]   ;;  %s1552_s7 = inlined_call_operand.vmem [shape: f32[1,128], index: 7, kind: input, shape index: {}]   ;;  %s1553_s8 = inlined_call_operand.hbm [shape: f32[32,128], index: 8, kind: input, shape index: {}]   ;;  %s1554_s9 = inlined_call_operand.vmem [shape: f32[1,128], index: 9, kind: input, shape index: {}]   ;;  %s1555_s10 = inlined_call_operand.hbm [shape: f32[64,128], index: 10, kind: output, shape index: {0}]   ;;  %s1556_s11 = inlined_call_operand.hbm [shape: f32[8,128], index: 11, kind: output, shape index: {1}]  }
   0x1   :  { %18 = vsyncpa [#allocation8], 0 }
   0x2   :  { %19 = vsyncpa [#allocation6], 0  ;;  %s46_s19 = sshll.u32 %s1551_s6, 4  ;;  %s47_s19 = int_to_ptr.hbm [resolvable:$true] %s46_s19 }
   0x3   :  { %20 = vsyncpa [#allocation12], 0  ;;  %s1223_s20 = smov [#allocation7]   ;;  %s34_s24 = sshll.u32 %s1549_s4, 4  ;;  %s35_s24 = int_to_ptr.hbm [resolvable:$true] %s34_s24 }
   0x4   :  { %s48_s21 = sshll.u32 %s1223_s20, 4  ;;  %s1224_s25 = smov 128   ;;  %s49_s21 = int_to_ptr.vmem [resolvable:$true] %s48_s21 }
   0x5   :  { %s1225_s26 = smov 8   ;;  %s1226_s27 = smov [#allocation4]  }
   0x6   :  { %54 = dma.hbm_to_vmem [thread:$0]  %s47_s19, 512, %s49_s21, [#allocation8], %s1224_s25, %s1224_s25, %s1225_s26  }
   0x7   :  { %s36_s28 = sshll.u32 %s1226_s27, 4  ;;  %s61_s30 = sshll.u32 %s1553_s8, 4  ;;  %s37_s28 = int_to_ptr.vmem [resolvable:$true] %s36_s28  ;;  %s62_s30 = int_to_ptr.hbm [resolvable:$true] %s61_s30 }
   0x8   :  { %39 = dma.hbm_to_vmem [thread:$0]  %s35_s24, 128, %s37_s28, [#allocation5]  }
   0x9   :  { %s1227_s12 = smov [#allocation9]  }
   0xa   :  { %s63_s13 = sshll.u32 %s1227_s12, 4  ;;  %s64_s13 = int_to_ptr.vmem [resolvable:$true] %s63_s13 }
   0xb   :  { %69 = dma.hbm_to_vmem [thread:$0]  %s62_s30, 512, %s64_s13, [#allocation8], %s1224_s25, %s1224_s25, %s1225_s26  }
   0xc   :  { %1215 = dma.done.wait [#allocation5], 128  }
   0xd   :  { %1216 = vsyncadd [#allocation5], 4294967168 }
   0xe   :  { %1217 = dma.done.wait [#allocation8], 1024  }
   0xf   :  { %1218 = vsyncadd [#allocation8], 4294966272  ;;  %v101_v0 = vld [vmem:[%s1546_s1 + $0x8] sm:$0xff]  ;;  %v100_v1 = vld [vmem:[%s1546_s1] sm:$0xff]  ;;  %vm106_vm0 = vcmask 130048   ;;  %vm186_vm1 = vcmask 261120  }
  0x10   :  { %v91_v2 = vld [vmem:[%s1545_s0 + $0x38] sm:$0xff]  ;;  %980 = vmatpush.msra.mxu2 %v101_v0  ;;  %145 = vmatpush.msra.mxu0 %v101_v0  ;;  %v84_v4 = vld [vmem:[%s1545_s0] sm:$0xff]  ;;  %v1330_v5 = vld [vmem:[%s1547_s2 + $0x10] sm:$0xff]  ;;  %s1228_s6 = smov 64   ;;  %s1229_s30 = smov 32  }
  0x11   :  { %999 = vtanh.f32 %v91_v2  ;;  %v1320_v3 = vld [vmem:[%s1547_s2 + $0x18] sm:$0xff]  ;;  %v1337_v6 = vld [vmem:[%s1547_s2 + $0x8] sm:$0xff]  ;;  %v1345_v8 = vld [vmem:[%s1547_s2] sm:$0xff]  ;;  %s1230_s1 = smov 96   ;;  %s930_s4 = sshll.u32 %s1556_s11, 4  ;;  %s931_s4 = int_to_ptr.hbm [resolvable:$true] %s930_s4 }
  0x12   :  { %420 = vmatpush.msra.mxu1 %v1320_v3  ;;  %564 = vmatpush.msra.mxu3 %v1320_v3  ;;  %1001 = vtanh.f32 %v84_v4  ;;  %v184_v10 = vld [vmem:[#allocation4] sm:$0xff]  ;;  %v85_v40 = vld [vmem:[%s1545_s0 + $0x8] sm:$0xff]  ;;  %s1232_s14 = smov [#allocation10]   ;;  %s916_s17 = sshll.u32 %s1555_s10, 4  ;;  %s917_s17 = int_to_ptr.hbm [resolvable:$true] %s916_s17 }
  0x13   :  { %981 = vmatpush.msra.mxu2 %v100_v1  ;;  %146 = vmatpush.msra.mxu0 %v100_v1  ;;  %v1372_v13 = vld [vmem:[%s1548_s3] ss:$0 sm:$0xff]  ;;  %s914_s15 = sshll.u32 %s1232_s14, 4  ;;  %s915_s15 = int_to_ptr.vmem [resolvable:$true] %s914_s15 }
  0x14   :  { %421 = vmatpush.msra.mxu1 %v1330_v5  ;;  %565 = vmatpush.msra.mxu3 %v1330_v5 }
  0x15   :  { %202 = vmatpush.msrb.mxu2 %v1320_v3 }
  0x16   :  { %422 = vmatpush.msra.mxu1 %v1337_v6  ;;  %566 = vmatpush.msra.mxu3 %v1337_v6 }
  0x17   :  { %203 = vmatpush.msrb.mxu2 %v1330_v5  ;;  %v1000_v7 = vpop.eup %999 }
  0x18   :  { %953 = vmatmul.msk.f32.vlgmr.msra.gmra.mxu2 %vm106_vm0, %v1000_v7  ;;  %423 = vmatpush.msra.mxu1 %v1345_v8  ;;  %v1002_v9 = vpop.eup %1001 }
  0x19   :  { %204 = vmatpush.msrb.mxu2 %v1337_v6  ;;  %567 = vmatpush.msra.mxu3 %v1345_v8 }
  0x1a   :  { %946 = vmatmul.msk.f32.vlgmr.msra.gmra.mxu0 %vm106_vm0, %v1002_v9  ;;  %636 = vmatpush.msrb.mxu1 %v1320_v3  ;;  %v86_v9 = vld [vmem:[%s1545_s0 + $0x10] sm:$0xff] }
  0x1b   :  { %205 = vmatpush.msrb.mxu2 %v1345_v8 }
  0x1c   :  { %637 = vmatpush.msrb.mxu1 %v1330_v5 }
  0x1d   :  { %276 = vmatpush.msra.mxu2 %v1320_v3 }
  0x1e   :  { %638 = vmatpush.msrb.mxu1 %v1337_v6 }
  0x1f   :  { %277 = vmatpush.msra.mxu2 %v1330_v5 }
  0x20   :  { %954 = vmatmul.msk.f32.vlgmr.msrb.gmra.mxu2 %vm186_vm1, %v184_v10  ;;  %639 = vmatpush.msrb.mxu1 %v1345_v8 }
  0x21   :  { %278 = vmatpush.msra.mxu2 %v1337_v6 }
  0x23   :  { %279 = vmatpush.msra.mxu2 %v1345_v8 }
  0x25   :  { %348 = vmatpush.msrb.mxu2 %v1320_v3 }
  0x27   :  { %349 = vmatpush.msrb.mxu2 %v1330_v5 }
  0x29   :  { %350 = vmatpush.msrb.mxu2 %v1337_v6 }
  0x2b   :  { %351 = vmatpush.msrb.mxu2 %v1345_v8 }
  0x97   :  { %v148_v12 = vpop.f32.mrf.mxu0 }
  0x98   :  { %v149_v14 = vadd.f32 %v1372_v13, %v148_v12 }
  0x9b   :  { %v1367_v11 = vpop.f32.mrf.mxu2 }
  0xa3   :  { %v207_v15 = vpop.f32.mrf.mxu2 }
  0xa4   :  { %v210_v16 = vadd.f32 %v207_v15, %v149_v14 }
  0xa6   :  { %1003 = vtanh.f32 %v210_v16  ;;  %v955_v18 = vmul.f32 -1.442695, %v210_v16 }
  0xa8   :  { %1005 = vpow2.f32 %v955_v18 }
  0xac   :  { %v1004_v17 = vpop.eup %1003 }
  0xad   :  { %236 = vrot.lane.b32.xlu0 %v1004_v17, %s1228_s6 }
  0xae   :  { %v1006_v19 = vpop.eup %1005 }
  0xaf   :  { %v214_v20 = vadd.f32 1.0, %v1006_v19 }
  0xb1   :  { %1007 = vrcp.f32 %v214_v20  ;;  %v226_v26 = vand.u32 2147483648, %v214_v20  ;;  %vm220_vm3 = vweird.f32 %v214_v20  ;;  %v224_v27 = vand.u32 2147483647, %v214_v20 }
  0xb3   :  { %v227_v29 = vor.u32 1.1754944e-38, %v226_v26  ;;  %vm225_vm5 = vcmp.eq.f32.partialorder %v224_v27, 8.507059e+37 }
  0xb5   :  { %231 = vrot.lane.b32.xlu0 %v184_v10, %s1229_s30 }
  0xb7   :  { %v1008_v21 = vpop.eup %1007 }
  0xb8   :  { %v216_v22 = vmul.f32 %v1008_v21, %v214_v20  ;;  %vm221_vm2 = vweird.f32 %v1008_v21 }
  0xb9   :  { %vm222_vm4 = vmor %vm220_vm3, %vm221_vm2 }
  0xba   :  { %v217_v23 = vsub.f32 1.0, %v216_v22 }
  0xbc   :  { %v218_v24 = vmul.f32 %v1008_v21, %v217_v23 }
  0xbe   :  { %v219_v25 = vadd.f32 %v1008_v21, %v218_v24 }
  0xc0   :  { %v223_v28 = vsel %vm222_vm4, %v1008_v21, %v219_v25 }
  0xc1   :  { %v228_v31 = vsel %vm225_vm5, %v227_v29, %v223_v28 }
 0x11f   :  { %v237_v30 = vpop.permute.xlu0 %236 }
 0x120   :  { %v239_v32 = vmul.f32 %v237_v30, %v228_v31 }
 0x122   :  { %241 = vrot.lane.b32.xlu1 %v239_v32, %s1229_s30 }
 0x127   :  { %v232_v33 = vpop.permute.xlu0 %231 }
 0x128   :  { %v234_v34 = vmul.f32 %v232_v33, %v228_v31 }
 0x194   :  { %v242_v35 = vpop.permute.xlu1 %241 }
 0x195   :  { %v244_v36 = vadd.f32 %v242_v35, %v234_v34  ;;  %v87_v34 = vld [vmem:[%s1545_s0 + $0x18] sm:$0xff] }
 0x197   :  { %1009 = vtanh.f32 %v244_v36 }
 0x198   :  { %1011 = vtanh.f32 %v85_v40 }
 0x19d   :  { %v1010_v37 = vpop.eup %1009 }
 0x19e   :  { %247 = vrot.lane.b32.xlu1 %v1010_v37, %s1228_s6  ;;  %v1012_v41 = vpop.eup %1011 }
 0x19f   :  { %947 = vmatmul.msk.f32.gmra.mxu0 %vm106_vm0, %v1012_v41 }
 0x210   :  { %v248_v38 = vpop.permute.xlu1 %247 }
 0x211   :  { %v1379_v39 = vmul.f32 %v248_v38, %v228_v31 }
 0x213   :  { %260 = vrot.lane.b32.xlu2 %v1379_v39, %s1229_s30 }
 0x21c   :  { %v151_v43 = vpop.f32.mrf.mxu0 }
 0x21d   :  { %v152_v44 = vadd.f32 %v1372_v13, %v151_v43 }
 0x26d   :  { %v261_v42 = vpop.permute.xlu2 %260 }
 0x26e   :  { %956 = vmatmul.msk.f32.vlgmr.msra.gmra.mxu2 %vm186_vm1, %v261_v42 }
 0x26f   :  { %492 = vmatpush.msra.mxu2 %v1320_v3 }
 0x271   :  { %493 = vmatpush.msra.mxu2 %v1330_v5 }
 0x273   :  { %494 = vmatpush.msra.mxu2 %v1337_v6 }
 0x275   :  { %495 = vmatpush.msra.mxu2 %v1345_v8 }
 0x2f1   :  { %v281_v45 = vpop.f32.mrf.mxu2 }
 0x2f2   :  { %v284_v46 = vadd.f32 %v281_v45, %v152_v44 }
 0x2f4   :  { %1013 = vtanh.f32 %v284_v46  ;;  %v957_v48 = vmul.f32 -1.442695, %v284_v46 }
 0x2f6   :  { %1015 = vpow2.f32 %v957_v48 }
 0x2fa   :  { %v1014_v47 = vpop.eup %1013 }
 0x2fb   :  { %307 = vrot.lane.b32.xlu2 %v1014_v47, %s1228_s6 }
 0x2fc   :  { %v1016_v49 = vpop.eup %1015 }
 0x2fd   :  { %v288_v50 = vadd.f32 1.0, %v1016_v49 }
 0x2ff   :  { %1017 = vrcp.f32 %v288_v50  ;;  %v300_v56 = vand.u32 2147483648, %v288_v50  ;;  %vm294_vm7 = vweird.f32 %v288_v50  ;;  %v298_v57 = vand.u32 2147483647, %v288_v50 }
 0x301   :  { %v301_v59 = vor.u32 1.1754944e-38, %v300_v56  ;;  %vm299_vm9 = vcmp.eq.f32.partialorder %v298_v57, 8.507059e+37 }
 0x305   :  { %v1018_v51 = vpop.eup %1017 }
 0x306   :  { %v290_v52 = vmul.f32 %v1018_v51, %v288_v50  ;;  %vm295_vm6 = vweird.f32 %v1018_v51 }
 0x307   :  { %vm296_vm8 = vmor %vm294_vm7, %vm295_vm6 }
 0x308   :  { %v291_v53 = vsub.f32 1.0, %v290_v52 }
 0x30a   :  { %v292_v54 = vmul.f32 %v1018_v51, %v291_v53 }
 0x30c   :  { %v293_v55 = vadd.f32 %v1018_v51, %v292_v54 }
 0x30e   :  { %v297_v58 = vsel %vm296_vm8, %v1018_v51, %v293_v55 }
 0x30f   :  { %v302_v61 = vsel %vm299_vm9, %v301_v59, %v297_v58 }
 0x310   :  { %v305_v63 = vmul.f32 %v302_v61, %v244_v36 }
 0x355   :  { %v308_v60 = vpop.permute.xlu2 %307 }
 0x356   :  { %v310_v62 = vmul.f32 %v308_v60, %v302_v61 }
 0x358   :  { %312 = vrot.lane.b32.xlu0 %v310_v62, %s1229_s30 }
 0x3ca   :  { %v313_v0 = vpop.permute.xlu0 %312 }
 0x3cb   :  { %v315_v1 = vadd.f32 %v313_v0, %v305_v63 }
 0x3cd   :  { %1019 = vtanh.f32 %v315_v1 }
 0x3ce   :  { %1021 = vtanh.f32 %v86_v9 }
 0x3d3   :  { %v1020_v2 = vpop.eup %1019 }
 0x3d4   :  { %318 = vrot.lane.b32.xlu1 %v1020_v2, %s1228_s6  ;;  %v1022_v10 = vpop.eup %1021  ;;  %v88_v2 = vld [vmem:[%s1545_s0 + $0x20] sm:$0xff] }
 0x3d5   :  { %948 = vmatmul.msk.f32.gmra.mxu0 %vm106_vm0, %v1022_v10 }
 0x446   :  { %v319_v4 = vpop.permute.xlu1 %318 }
 0x447   :  { %v1396_v7 = vmul.f32 %v319_v4, %v302_v61 }
 0x449   :  { %332 = vrot.lane.b32.xlu2 %v1396_v7, %s1229_s30 }
 0x452   :  { %v154_v14 = vpop.f32.mrf.mxu0 }
 0x453   :  { %v155_v15 = vadd.f32 %v1372_v13, %v154_v14 }
 0x4a3   :  { %v333_v12 = vpop.permute.xlu2 %332 }
 0x4a4   :  { %958 = vmatmul.msk.f32.vlgmr.msrb.gmra.mxu2 %vm186_vm1, %v333_v12 }
 0x4a5   :  { %708 = vmatpush.msrb.mxu2 %v1320_v3 }
 0x4a7   :  { %709 = vmatpush.msrb.mxu2 %v1330_v5 }
 0x4a9   :  { %710 = vmatpush.msrb.mxu2 %v1337_v6 }
 0x4ab   :  { %711 = vmatpush.msrb.mxu2 %v1345_v8 }
 0x527   :  { %v353_v16 = vpop.f32.mrf.mxu2 }
 0x528   :  { %v356_v17 = vadd.f32 %v353_v16, %v155_v15 }
 0x52a   :  { %1023 = vtanh.f32 %v356_v17  ;;  %v959_v19 = vmul.f32 -1.442695, %v356_v17 }
 0x52c   :  { %1025 = vpow2.f32 %v959_v19 }
 0x530   :  { %v1024_v18 = vpop.eup %1023 }
 0x531   :  { %379 = vrot.lane.b32.xlu0 %v1024_v18, %s1228_s6 }
 0x532   :  { %v1026_v20 = vpop.eup %1025 }
 0x533   :  { %v360_v21 = vadd.f32 1.0, %v1026_v20 }
 0x535   :  { %1027 = vrcp.f32 %v360_v21  ;;  %v372_v8 = vand.u32 2147483648, %v360_v21  ;;  %vm366_vm11 = vweird.f32 %v360_v21  ;;  %v370_v24 = vand.u32 2147483647, %v360_v21 }
 0x537   :  { %v373_v26 = vor.u32 1.1754944e-38, %v372_v8  ;;  %vm371_vm13 = vcmp.eq.f32.partialorder %v370_v24, 8.507059e+37 }
 0x53b   :  { %v1028_v3 = vpop.eup %1027 }
 0x53c   :  { %v362_v5 = vmul.f32 %v1028_v3, %v360_v21  ;;  %vm367_vm10 = vweird.f32 %v1028_v3 }
 0x53d   :  { %vm368_vm12 = vmor %vm366_vm11, %vm367_vm10 }
 0x53e   :  { %v363_v22 = vsub.f32 1.0, %v362_v5 }
 0x540   :  { %v364_v6 = vmul.f32 %v1028_v3, %v363_v22 }
 0x542   :  { %v365_v23 = vadd.f32 %v1028_v3, %v364_v6 }
 0x544   :  { %v369_v25 = vsel %vm368_vm12, %v1028_v3, %v365_v23 }
 0x545   :  { %v374_v28 = vsel %vm371_vm13, %v373_v26, %v369_v25 }
 0x546   :  { %v377_v30 = vmul.f32 %v374_v28, %v315_v1 }
 0x5a3   :  { %v380_v27 = vpop.permute.xlu0 %379 }
 0x5a4   :  { %v382_v29 = vmul.f32 %v380_v27, %v374_v28 }
 0x5a6   :  { %384 = vrot.lane.b32.xlu1 %v382_v29, %s1229_s30 }
 0x618   :  { %v385_v31 = vpop.permute.xlu1 %384 }
 0x619   :  { %v387_v32 = vadd.f32 %v385_v31, %v377_v30 }
 0x61b   :  { %1029 = vtanh.f32 %v387_v32 }
 0x61c   :  { %1031 = vtanh.f32 %v87_v34  ;;  %v89_v34 = vld [vmem:[%s1545_s0 + $0x28] sm:$0xff] }
 0x621   :  { %v1030_v33 = vpop.eup %1029 }
 0x622   :  { %390 = vrot.lane.b32.xlu2 %v1030_v33, %s1228_s6  ;;  %v1032_v35 = vpop.eup %1031 }
 0x623   :  { %949 = vmatmul.msk.f32.gmra.mxu0 %vm106_vm0, %v1032_v35 }
 0x67c   :  { %v391_v36 = vpop.permute.xlu2 %390 }
 0x67d   :  { %v1417_v37 = vmul.f32 %v391_v36, %v374_v28 }
 0x67f   :  { %404 = vrot.lane.b32.xlu0 %v1417_v37, %s1229_s30 }
 0x6a0   :  { %v157_v40 = vpop.f32.mrf.mxu0 }
 0x6a1   :  { %v158_v41 = vadd.f32 %v1372_v13, %v157_v40 }
 0x6f1   :  { %v405_v38 = vpop.permute.xlu0 %404 }
 0x6f2   :  { %960 = vmatmul.msk.f32.vlgmr.msra.gmra.mxu1 %vm186_vm1, %v405_v38 }
 0x76f   :  { %v425_v42 = vpop.f32.mrf.mxu1 }
 0x770   :  { %v428_v43 = vadd.f32 %v425_v42, %v158_v41 }
 0x772   :  { %1033 = vtanh.f32 %v428_v43  ;;  %v961_v45 = vmul.f32 -1.442695, %v428_v43 }
 0x774   :  { %1035 = vpow2.f32 %v961_v45 }
 0x778   :  { %v1034_v44 = vpop.eup %1033 }
 0x779   :  { %451 = vrot.lane.b32.xlu1 %v1034_v44, %s1228_s6 }
 0x77a   :  { %v1036_v46 = vpop.eup %1035 }
 0x77b   :  { %v432_v47 = vadd.f32 1.0, %v1036_v46 }
 0x77d   :  { %1037 = vrcp.f32 %v432_v47  ;;  %v444_v53 = vand.u32 2147483648, %v432_v47  ;;  %vm438_vm15 = vweird.f32 %v432_v47  ;;  %v442_v54 = vand.u32 2147483647, %v432_v47 }
 0x77f   :  { %v445_v56 = vor.u32 1.1754944e-38, %v444_v53  ;;  %vm443_vm3 = vcmp.eq.f32.partialorder %v442_v54, 8.507059e+37 }
 0x783   :  { %v1038_v48 = vpop.eup %1037 }
 0x784   :  { %v434_v49 = vmul.f32 %v1038_v48, %v432_v47  ;;  %vm439_vm14 = vweird.f32 %v1038_v48 }
 0x785   :  { %vm440_vm2 = vmor %vm438_vm15, %vm439_vm14 }
 0x786   :  { %v435_v50 = vsub.f32 1.0, %v434_v49 }
 0x788   :  { %v436_v51 = vmul.f32 %v1038_v48, %v435_v50 }
 0x78a   :  { %v437_v52 = vadd.f32 %v1038_v48, %v436_v51 }
 0x78c   :  { %v441_v55 = vsel %vm440_vm2, %v1038_v48, %v437_v52 }
 0x78d   :  { %v446_v58 = vsel %vm443_vm3, %v445_v56, %v441_v55 }
 0x78e   :  { %v449_v60 = vmul.f32 %v446_v58, %v387_v32 }
 0x7eb   :  { %v452_v57 = vpop.permute.xlu1 %451 }
 0x7ec   :  { %v454_v59 = vmul.f32 %v452_v57, %v446_v58 }
 0x7ee   :  { %456 = vrot.lane.b32.xlu2 %v454_v59, %s1229_s30 }
 0x848   :  { %v457_v61 = vpop.permute.xlu2 %456 }
 0x849   :  { %v459_v62 = vadd.f32 %v457_v61, %v449_v60 }
 0x84b   :  { %1039 = vtanh.f32 %v459_v62 }
 0x84c   :  { %1041 = vtanh.f32 %v88_v2 }
 0x851   :  { %v1040_v63 = vpop.eup %1039 }
 0x852   :  { %462 = vrot.lane.b32.xlu0 %v1040_v63, %s1228_s6  ;;  %v1042_v4 = vpop.eup %1041  ;;  %v90_v63 = vld [vmem:[%s1545_s0 + $0x30] sm:$0xff] }
 0x853   :  { %950 = vmatmul.msk.f32.gmra.mxu0 %vm106_vm0, %v1042_v4 }
 0x8c4   :  { %v463_v0 = vpop.permute.xlu0 %462 }
 0x8c5   :  { %v1426_v1 = vmul.f32 %v463_v0, %v446_v58 }
 0x8c7   :  { %476 = vrot.lane.b32.xlu1 %v1426_v1, %s1229_s30 }
 0x8d0   :  { %v160_v10 = vpop.f32.mrf.mxu0 }
 0x8d1   :  { %v161_v12 = vadd.f32 %v1372_v13, %v160_v10 }
 0x939   :  { %v477_v9 = vpop.permute.xlu1 %476 }
 0x93a   :  { %962 = vmatmul.msk.f32.vlgmr.msra.gmra.mxu2 %vm186_vm1, %v477_v9 }
 0x9bd   :  { %v497_v14 = vpop.f32.mrf.mxu2 }
 0x9be   :  { %v500_v15 = vadd.f32 %v497_v14, %v161_v12 }
 0x9c0   :  { %1043 = vtanh.f32 %v500_v15  ;;  %v963_v17 = vmul.f32 -1.442695, %v500_v15 }
 0x9c2   :  { %1045 = vpow2.f32 %v963_v17 }
 0x9c6   :  { %v1044_v16 = vpop.eup %1043 }
 0x9c7   :  { %523 = vrot.lane.b32.xlu2 %v1044_v16, %s1228_s6 }
 0x9c8   :  { %v1046_v18 = vpop.eup %1045 }
 0x9c9   :  { %v504_v19 = vadd.f32 1.0, %v1046_v18 }
 0x9cb   :  { %1047 = vrcp.f32 %v504_v19  ;;  %v516_v6 = vand.u32 2147483648, %v504_v19  ;;  %vm510_vm5 = vweird.f32 %v504_v19  ;;  %v514_v23 = vand.u32 2147483647, %v504_v19 }
 0x9cd   :  { %v517_v24 = vor.u32 1.1754944e-38, %v516_v6  ;;  %vm515_vm7 = vcmp.eq.f32.partialorder %v514_v23, 8.507059e+37 }
 0x9d1   :  { %v1048_v20 = vpop.eup %1047 }
 0x9d2   :  { %v506_v21 = vmul.f32 %v1048_v20, %v504_v19  ;;  %vm511_vm4 = vweird.f32 %v1048_v20 }
 0x9d3   :  { %vm512_vm6 = vmor %vm510_vm5, %vm511_vm4 }
 0x9d4   :  { %v507_v3 = vsub.f32 1.0, %v506_v21 }
 0x9d6   :  { %v508_v5 = vmul.f32 %v1048_v20, %v507_v3 }
 0x9d8   :  { %v509_v22 = vadd.f32 %v1048_v20, %v508_v5 }
 0x9da   :  { %v513_v8 = vsel %vm512_vm6, %v1048_v20, %v509_v22 }
 0x9db   :  { %v518_v26 = vsel %vm515_vm7, %v517_v24, %v513_v8 }
 0x9dc   :  { %v521_v28 = vmul.f32 %v518_v26, %v459_v62 }
 0xa21   :  { %v524_v25 = vpop.permute.xlu2 %523 }
 0xa22   :  { %v526_v27 = vmul.f32 %v524_v25, %v518_v26 }
 0xa24   :  { %528 = vrot.lane.b32.xlu0 %v526_v27, %s1229_s30 }
 0xa96   :  { %v529_v29 = vpop.permute.xlu0 %528 }
 0xa97   :  { %v531_v30 = vadd.f32 %v529_v29, %v521_v28 }
 0xa99   :  { %1049 = vtanh.f32 %v531_v30 }
 0xa9a   :  { %1051 = vtanh.f32 %v89_v34 }
 0xa9f   :  { %v1050_v31 = vpop.eup %1049 }
 0xaa0   :  { %534 = vrot.lane.b32.xlu1 %v1050_v31, %s1228_s6  ;;  %v1052_v35 = vpop.eup %1051 }
 0xaa1   :  { %951 = vmatmul.msk.f32.gmra.mxu0 %vm106_vm0, %v1052_v35 }
 0xb12   :  { %v535_v32 = vpop.permute.xlu1 %534 }
 0xb13   :  { %v1439_v33 = vmul.f32 %v535_v32, %v518_v26 }
 0xb15   :  { %548 = vrot.lane.b32.xlu2 %v1439_v33, %s1229_s30 }
 0xb1e   :  { %v163_v38 = vpop.f32.mrf.mxu0 }
 0xb1f   :  { %v164_v40 = vadd.f32 %v1372_v13, %v163_v38 }
 0xb6f   :  { %v549_v36 = vpop.permute.xlu2 %548 }
 0xb70   :  { %964 = vmatmul.msk.f32.vlgmr.msra.gmra.mxu3 %vm186_vm1, %v549_v36  ;;  %v170_v36 = vadd.f32 %v1372_v13, %v1367_v11 }
 0xbf3   :  { %v569_v41 = vpop.f32.mrf.mxu3 }
 0xbf4   :  { %v572_v42 = vadd.f32 %v569_v41, %v164_v40 }
 0xbf6   :  { %1053 = vtanh.f32 %v572_v42  ;;  %v965_v44 = vmul.f32 -1.442695, %v572_v42 }
 0xbf8   :  { %1055 = vpow2.f32 %v965_v44 }
 0xbfc   :  { %v1054_v43 = vpop.eup %1053 }
 0xbfd   :  { %595 = vrot.lane.b32.xlu0 %v1054_v43, %s1228_s6 }
 0xbfe   :  { %v1056_v45 = vpop.eup %1055 }
 0xbff   :  { %v576_v46 = vadd.f32 1.0, %v1056_v45 }
 0xc01   :  { %1057 = vrcp.f32 %v576_v46  ;;  %v588_v52 = vand.u32 2147483648, %v576_v46  ;;  %vm582_vm9 = vweird.f32 %v576_v46  ;;  %v586_v53 = vand.u32 2147483647, %v576_v46 }
 0xc03   :  { %v589_v55 = vor.u32 1.1754944e-38, %v588_v52  ;;  %vm587_vm11 = vcmp.eq.f32.partialorder %v586_v53, 8.507059e+37 }
 0xc07   :  { %v1058_v47 = vpop.eup %1057 }
 0xc08   :  { %v578_v48 = vmul.f32 %v1058_v47, %v576_v46  ;;  %vm583_vm8 = vweird.f32 %v1058_v47  ;;  %v772_v46 = vld [vmem:[#allocation9 + $0x18] sm:$0xff] }
 0xc09   :  { %vm584_vm10 = vmor %vm582_vm9, %vm583_vm8  ;;  %982 = vmatpush.msrb.mxu3 %v772_v46  ;;  %813 = vmatpush.msra.mxu1 %v772_v46 }
 0xc0a   :  { %v579_v49 = vsub.f32 1.0, %v578_v48  ;;  %v770_v48 = vld [vmem:[#allocation9 + $0x8] sm:$0xff] }
 0xc0c   :  { %v580_v50 = vmul.f32 %v1058_v47, %v579_v49 }
 0xc0e   :  { %v581_v51 = vadd.f32 %v1058_v47, %v580_v50  ;;  %v769_v50 = vld [vmem:[#allocation9] sm:$0xff] }
 0xc10   :  { %v585_v54 = vsel %vm584_vm10, %v1058_v47, %v581_v51 }
 0xc11   :  { %v590_v57 = vsel %vm587_vm11, %v589_v55, %v585_v54 }
 0xc12   :  { %v593_v59 = vmul.f32 %v590_v57, %v531_v30 }
 0xc6f   :  { %v596_v56 = vpop.permute.xlu0 %595 }
 0xc70   :  { %v598_v58 = vmul.f32 %v596_v56, %v590_v57 }
 0xc72   :  { %600 = vrot.lane.b32.xlu1 %v598_v58, %s1229_s30 }
 0xce4   :  { %v601_v60 = vpop.permute.xlu1 %600 }
 0xce5   :  { %v603_v61 = vadd.f32 %v601_v60, %v593_v59 }
 0xce7   :  { %1059 = vtanh.f32 %v603_v61 }
 0xce8   :  { %1061 = vtanh.f32 %v90_v63 }
 0xced   :  { %v1060_v62 = vpop.eup %1059 }
 0xcee   :  { %606 = vrot.lane.b32.xlu2 %v1060_v62, %s1228_s6  ;;  %v1062_v0 = vpop.eup %1061 }
 0xcef   :  { %952 = vmatmul.msk.f32.gmra.mxu0 %vm106_vm0, %v1062_v0 }
 0xd48   :  { %v607_v2 = vpop.permute.xlu2 %606 }
 0xd49   :  { %v609_v4 = vmul.f32 %v607_v2, %v590_v57 }
 0xd4b   :  { %620 = vrot.lane.b32.xlu0 %v609_v4, %s1229_s30 }
 0xd6c   :  { %v166_v10 = vpop.f32.mrf.mxu0 }
 0xd6d   :  { %v167_v12 = vadd.f32 %v1372_v13, %v166_v10 }
 0xdbd   :  { %v621_v9 = vpop.permute.xlu0 %620 }
 0xdbe   :  { %966 = vmatmul.msk.f32.vlgmr.msrb.gmra.mxu1 %vm186_vm1, %v621_v9 }
 0xe3b   :  { %v641_v14 = vpop.f32.mrf.mxu1 }
 0xe3c   :  { %v644_v15 = vadd.f32 %v641_v14, %v167_v12 }
 0xe3e   :  { %1063 = vtanh.f32 %v644_v15  ;;  %v967_v17 = vmul.f32 -1.442695, %v644_v15 }
 0xe40   :  { %1065 = vpow2.f32 %v967_v17 }
 0xe44   :  { %v1064_v16 = vpop.eup %1063 }
 0xe45   :  { %667 = vrot.lane.b32.xlu1 %v1064_v16, %s1228_s6 }
 0xe46   :  { %v1066_v18 = vpop.eup %1065 }
 0xe47   :  { %v648_v19 = vadd.f32 1.0, %v1066_v18 }
 0xe49   :  { %1067 = vrcp.f32 %v648_v19  ;;  %v660_v6 = vand.u32 2147483648, %v648_v19  ;;  %vm654_vm12 = vweird.f32 %v648_v19  ;;  %v658_v23 = vand.u32 2147483647, %v648_v19 }
 0xe4b   :  { %v661_v24 = vor.u32 1.1754944e-38, %v660_v6  ;;  %vm659_vm14 = vcmp.eq.f32.partialorder %v658_v23, 8.507059e+37  ;;  %v854_v6 = vld [vmem:[#allocation7] sm:$0xff] }
 0xe4f   :  { %v1068_v20 = vpop.eup %1067 }
 0xe50   :  { %v650_v21 = vmul.f32 %v1068_v20, %v648_v19  ;;  %vm655_vm0 = vweird.f32 %v1068_v20 }
 0xe51   :  { %vm656_vm13 = vmor %vm654_vm12, %vm655_vm0 }
 0xe52   :  { %v651_v3 = vsub.f32 1.0, %v650_v21 }
 0xe54   :  { %v652_v5 = vmul.f32 %v1068_v20, %v651_v3  ;;  %v857_v3 = vld [vmem:[#allocation7 + $0x18] sm:$0xff] }
 0xe56   :  { %v653_v22 = vadd.f32 %v1068_v20, %v652_v5  ;;  %v856_v5 = vld [vmem:[#allocation7 + $0x10] sm:$0xff] }
 0xe58   :  { %v657_v8 = vsel %vm656_vm13, %v1068_v20, %v653_v22  ;;  %v855_v22 = vld [vmem:[#allocation7 + $0x8] sm:$0xff] }
 0xe59   :  { %v662_v26 = vsel %vm659_vm14, %v661_v24, %v657_v8  ;;  %v853_v24 = vld [vmem:[%s1550_s5 + $0x18] sm:$0xff] }
 0xe5a   :  { %v665_v28 = vmul.f32 %v662_v26, %v603_v61  ;;  %896 = vmatpush.msra.mxu2 %v853_v24 }
 0xeb7   :  { %v668_v25 = vpop.permute.xlu1 %667 }
 0xeb8   :  { %v670_v27 = vmul.f32 %v668_v25, %v662_v26  ;;  %v852_v25 = vld [vmem:[%s1550_s5 + $0x10] sm:$0xff] }
 0xeb9   :  { %897 = vmatpush.msra.mxu2 %v852_v25 }
 0xeba   :  { %672 = vrot.lane.b32.xlu2 %v670_v27, %s1229_s30  ;;  %v850_v27 = vld [vmem:[%s1550_s5] sm:$0xff] }
 0xf14   :  { %v673_v29 = vpop.permute.xlu2 %672 }
 0xf15   :  { %v1461_v30 = vadd.f32 %v673_v29, %v665_v28 }
 0xf17   :  { %1069 = vtanh.f32 %v1461_v30 }
 0xf1d   :  { %v1070_v31 = vpop.eup %1069 }
 0xf1e   :  { %678 = vrot.lane.b32.xlu0 %v1070_v31, %s1228_s6 }
 0xf90   :  { %v679_v32 = vpop.permute.xlu0 %678 }
 0xf91   :  { %v1465_v34 = vmul.f32 %v679_v32, %v662_v26  ;;  %v851_v26 = vld [vmem:[%s1550_s5 + $0x8] sm:$0xff] }
 0xf92   :  { %898 = vmatpush.msra.mxu2 %v851_v26 }
 0xf93   :  { %692 = vrot.lane.b32.xlu1 %v1465_v34, %s1229_s30 }
 0xf94   :  { %899 = vmatpush.msra.mxu2 %v850_v27 }
0x1005   :  { %v693_v35 = vpop.permute.xlu1 %692 }
0x1006   :  { %968 = vmatmul.msk.f32.vlgmr.msrb.gmra.mxu2 %vm186_vm1, %v693_v35 }
0x1089   :  { %v713_v38 = vpop.f32.mrf.mxu2 }
0x108a   :  { %v716_v40 = vadd.f32 %v713_v38, %v170_v36 }
0x108c   :  { %1071 = vtanh.f32 %v716_v40  ;;  %v969_v11 = vmul.f32 -1.442695, %v716_v40 }
0x108d   :  { %1073 = vtanh.f32 %v1426_v1  ;;  %v771_v1 = vld [vmem:[#allocation9 + $0x10] sm:$0xff] }
0x108e   :  { %1075 = vtanh.f32 %v609_v4  ;;  %983 = vmatpush.msrb.mxu3 %v771_v1  ;;  %814 = vmatpush.msra.mxu1 %v771_v1 }
0x108f   :  { %1077 = vtanh.f32 %v1417_v37 }
0x1090   :  { %1079 = vpow2.f32 %v969_v11  ;;  %984 = vmatpush.msrb.mxu3 %v770_v48  ;;  %815 = vmatpush.msra.mxu1 %v770_v48  ;;  %v998_v48 = vld [vmem:[%s1552_s7] ss:$0 sm:$0xff] }
0x1092   :  { %v1072_v41 = vpop.eup %1071  ;;  %985 = vmatpush.msrb.mxu3 %v769_v50  ;;  %816 = vmatpush.msra.mxu1 %v769_v50 }
0x1093   :  { %739 = vrot.lane.b32.xlu2 %v1072_v41, %s1228_s6  ;;  %v1074_v42 = vpop.eup %1073 }
0x1094   :  { %v1076_v43 = vpop.eup %1075  ;;  %874 = vmatpush.msrb.mxu1 %v857_v3 }
0x1095   :  { %v1078_v44 = vpop.eup %1077 }
0x1096   :  { %v1080_v13 = vpop.eup %1079  ;;  %875 = vmatpush.msrb.mxu1 %v856_v5 }
0x1097   :  { %v720_v45 = vadd.f32 1.0, %v1080_v13 }
0x1098   :  { %876 = vmatpush.msrb.mxu1 %v855_v22 }
0x1099   :  { %1081 = vrcp.f32 %v720_v45  ;;  %v732_v53 = vand.u32 2147483648, %v720_v45  ;;  %vm726_vm2 = vweird.f32 %v720_v45  ;;  %v730_v54 = vand.u32 2147483647, %v720_v45 }
0x109a   :  { %1083 = vtanh.f32 %v1439_v33  ;;  %877 = vmatpush.msrb.mxu1 %v854_v6 }
0x109b   :  { %468 = vrot.lane.b32.xlu2 %v1074_v42, %s1229_s30  ;;  %v733_v56 = vor.u32 1.1754944e-38, %v732_v53  ;;  %vm731_vm4 = vcmp.eq.f32.partialorder %v730_v54, 8.507059e+37  ;;  %1085 = vtanh.f32 %v1396_v7 }
0x109f   :  { %v1082_v47 = vpop.eup %1081 }
0x10a0   :  { %v722_v49 = vmul.f32 %v1082_v47, %v720_v45  ;;  %vm727_vm15 = vweird.f32 %v1082_v47  ;;  %v1084_v61 = vpop.eup %1083 }
0x10a1   :  { %vm728_vm3 = vmor %vm726_vm2, %vm727_vm15  ;;  %v1086_v0 = vpop.eup %1085 }
0x10a2   :  { %v723_v37 = vsub.f32 1.0, %v722_v49 }
0x10a3   :  { %612 = vrot.lane.b32.xlu2 %v1076_v43, %s1229_s30 }
0x10a4   :  { %v724_v51 = vmul.f32 %v1082_v47, %v723_v37 }
0x10a6   :  { %v725_v52 = vadd.f32 %v1082_v47, %v724_v51 }
0x10a8   :  { %v729_v55 = vsel %vm728_vm3, %v1082_v47, %v725_v52 }
0x10a9   :  { %v734_v58 = vsel %vm731_vm4, %v733_v56, %v729_v55 }
0x10aa   :  { %v737_v33 = vmul.f32 %v734_v58, %v1461_v30 }
0x10ab   :  { %396 = vrot.lane.b32.xlu2 %v1078_v44, %s1229_s30 }
0x10ed   :  { %v740_v57 = vpop.permute.xlu2 %739 }
0x10ee   :  { %v742_v59 = vmul.f32 %v740_v57, %v734_v58 }
0x10f0   :  { %744 = vrot.lane.b32.xlu0 %v742_v59, %s1229_s30 }
0x10f5   :  { %v469_v60 = vpop.permute.xlu2 %468 }
0x10f6   :  { %472 = vst.msk [vmem:[#allocation3 + $0x18] sm:$0xff] %vm186_vm1, %v469_v60 }
0x10f8   :  { %540 = vrot.lane.b32.xlu0 %v1084_v61, %s1229_s30 }
0x10fd   :  { %v613_v62 = vpop.permute.xlu2 %612  ;;  %v764_v63 = vld [vmem:[#allocation3 + $0x18] sm:$0xff] }
0x10fe   :  { %616 = vst.msk [vmem:[#allocation3 + $0x28] sm:$0xff] %vm186_vm1, %v613_v62  ;;  %973 = vmatmul.msk.f32.vlgmr.msrb.gmra.mxu3 %vm186_vm1, %v764_v63 }
0x1100   :  { %324 = vrot.lane.b32.xlu0 %v1086_v0, %s1229_s30 }
0x1105   :  { %v397_v2 = vpop.permute.xlu2 %396  ;;  %v766_v16 = vld [vmem:[#allocation3 + $0x28] sm:$0xff] }
0x1106   :  { %400 = vst.msk [vmem:[#allocation3 + $0x10] sm:$0xff] %vm186_vm1, %v397_v2 }
0x110d   :  { %v763_v36 = vld [vmem:[#allocation3 + $0x10] sm:$0xff] }
0x1162   :  { %v745_v4 = vpop.permute.xlu0 %744 }
0x1163   :  { %v747_v9 = vadd.f32 %v745_v4, %v737_v33 }
0x1165   :  { %1087 = vtanh.f32 %v747_v9 }
0x1166   :  { %1089 = vtanh.f32 %v1379_v39  ;;  %v1500_v39 = vld [vmem:[%s1554_s9] ss:$0 sm:$0xff] }
0x1167   :  { %1091 = vtanh.f32 %v1465_v34 }
0x116a   :  { %v541_v10 = vpop.permute.xlu0 %540 }
0x116b   :  { %v1088_v12 = vpop.eup %1087  ;;  %544 = vst.msk [vmem:[#allocation3 + $0x20] sm:$0xff] %vm186_vm1, %v541_v10 }
0x116c   :  { %750 = vrot.lane.b32.xlu1 %v1088_v12, %s1228_s6  ;;  %v1090_v15 = vpop.eup %1089 }
0x116d   :  { %v1092_v17 = vpop.eup %1091 }
0x1172   :  { %v325_v7 = vpop.permute.xlu0 %324  ;;  %v765_v14 = vld [vmem:[#allocation3 + $0x20] sm:$0xff] }
0x1173   :  { %328 = vst.msk [vmem:[#allocation3 + $0x8] sm:$0xff] %vm186_vm1, %v325_v7  ;;  %974 = vmatmul.msk.f32.gmra.mxu3 %vm186_vm1, %v765_v14 }
0x1174   :  { %253 = vrot.lane.b32.xlu1 %v1090_v15, %s1229_s30 }
0x117a   :  { %v762_v31 = vld [vmem:[#allocation3 + $0x8] sm:$0xff] }
0x117b   :  { %975 = vmatmul.msk.f32.gmra.mxu3 %vm186_vm1, %v766_v16 }
0x117c   :  { %684 = vrot.lane.b32.xlu1 %v1092_v17, %s1229_s30 }
0x1181   :  { %v827_v18 = vpop.f32.mrf.mxu3 }
0x1182   :  { %v828_v19 = vadd.f32 %v1500_v39, %v827_v18 }
0x1184   :  { %845 = vst [vmem:[#allocation10 + $0x18] sm:$0xff] %v828_v19  ;;  %858 = vrot.lane.b32.xlu1 %v1088_v12, %s1230_s1 }
0x11de   :  { %v751_v20 = vpop.permute.xlu1 %750 }
0x11df   :  { %v753_v21 = vmul.f32 %v751_v20, %v734_v58 }
0x11e1   :  { %1093 = vtanh.f32 %v753_v21 }
0x11e6   :  { %v254_v23 = vpop.permute.xlu1 %253 }
0x11e7   :  { %v1094_v8 = vpop.eup %1093  ;;  %256 = vst.msk [vmem:[#allocation3] sm:$0xff] %vm186_vm1, %v254_v23 }
0x11e8   :  { %756 = vrot.lane.b32.xlu0 %v1094_v8, %s1229_s30  ;;  %s1231_s30 = smov [#allocation11]  }
0x11e9   :  { %s928_s3 = sshll.u32 %s1231_s30, 4  ;;  %s929_s3 = int_to_ptr.vmem [resolvable:$true] %s928_s3 }
0x11ee   :  { %v685_v28 = vpop.permute.xlu1 %684  ;;  %v761_v29 = vld [vmem:[#allocation3] sm:$0xff] }
0x11ef   :  { %688 = vst.msk [vmem:[#allocation3 + $0x30] sm:$0xff] %vm186_vm1, %v685_v28  ;;  %970 = vmatmul.msk.f32.vlgmr.msra.gmra.mxu1 %vm186_vm1, %v761_v29 }
0x11f6   :  { %v830_v30 = vpop.f32.mrf.mxu3  ;;  %v767_v32 = vld [vmem:[#allocation3 + $0x30] sm:$0xff]  ;;  %v859_v40 = vpop.permute.xlu1 %858 }
0x11f7   :  { %v831_v34 = vadd.f32 %v1500_v39, %v830_v30  ;;  %971 = vmatmul.msk.f32.gmra.mxu1 %vm186_vm1, %v762_v31  ;;  %976 = vmatmul.msk.f32.gmra.mxu3 %vm186_vm1, %v767_v32 }
0x11f9   :  { %846 = vst [vmem:[#allocation10 + $0x20] sm:$0xff] %v831_v34 }
0x11fe   :  { %v833_v35 = vpop.f32.mrf.mxu3 }
0x11ff   :  { %v834_v38 = vadd.f32 %v1500_v39, %v833_v35  ;;  %972 = vmatmul.msk.f32.gmra.mxu1 %vm186_vm1, %v763_v36 }
0x1201   :  { %847 = vst [vmem:[#allocation10 + $0x28] sm:$0xff] %v834_v38 }
0x1207   :  { %978 = vmatmul.msk.f32.vlgmr.msrb.gmra.mxu1 %vm186_vm1, %v859_v40 }
0x125a   :  { %v757_v41 = vpop.permute.xlu0 %756 }
0x125b   :  { %760 = vst.msk [vmem:[#allocation3 + $0x38] sm:$0xff] %vm186_vm1, %v757_v41  ;;  %979 = vmatmul.msk.f32.vlgmr.msra.gmra.mxu2 %vm186_vm1, %v757_v41 }
0x1262   :  { %v768_v42 = vld [vmem:[#allocation3 + $0x38] sm:$0xff] }
0x1263   :  { %977 = vmatmul.msk.f32.gmra.mxu3 %vm186_vm1, %v768_v42 }
0x126c   :  { %v818_v43 = vpop.f32.mrf.mxu1 }
0x126d   :  { %v819_v44 = vadd.f32 %v1500_v39, %v818_v43 }
0x126f   :  { %842 = vst [vmem:[#allocation10] sm:$0xff] %v819_v44 }
0x1274   :  { %v821_v11 = vpop.f32.mrf.mxu1 }
0x1275   :  { %v822_v13 = vadd.f32 %v1500_v39, %v821_v11 }
0x1277   :  { %843 = vst [vmem:[#allocation10 + $0x8] sm:$0xff] %v822_v13 }
0x127a   :  { %v836_v45 = vpop.f32.mrf.mxu3 }
0x127b   :  { %v837_v46 = vadd.f32 %v1500_v39, %v836_v45 }
0x127c   :  { %v824_v47 = vpop.f32.mrf.mxu1 }
0x127d   :  { %848 = vst [vmem:[#allocation10 + $0x30] sm:$0xff] %v837_v46  ;;  %v825_v1 = vadd.f32 %v1500_v39, %v824_v47 }
0x127f   :  { %844 = vst [vmem:[#allocation10 + $0x10] sm:$0xff] %v825_v1 }
0x1284   :  { %v879_v49 = vpop.f32.mrf.mxu1 }
0x12de   :  { %v901_v50 = vpop.f32.mrf.mxu2 }
0x12df   :  { %v902_v37 = vadd.f32 %v901_v50, %v879_v49 }
0x12e1   :  { %v908_v51 = vadd.f32 %v998_v48, %v902_v37 }
0x12e3   :  { %909 = vst [vmem:[#allocation11] sm:$0xff] %v908_v51 }
0x12e4   :  { %933 = dma.vmem_to_hbm [thread:$0]  %s929_s3, 128, %s931_s4, [#allocation12]  }
0x12e6   :  { %v839_v52 = vpop.f32.mrf.mxu3 }
0x12e7   :  { %v840_v53 = vadd.f32 %v1500_v39, %v839_v52 }
0x12e9   :  { %849 = vst [vmem:[#allocation10 + $0x38] sm:$0xff] %v840_v53 }
0x12ea   :  { %922 = dma.vmem_to_hbm [thread:$0]  %s915_s15, 1024, %s917_s17, [#allocation6], %s1224_s25, %s1224_s25, %s1225_s26  }
0x12eb   :  { %1219 = dma.done.wait [#allocation6], 1024  }
0x12ec   :  { %1220 = vsyncadd [#allocation6], 4294966272 }
0x12ed   :  { %1221 = dma.done.wait [#allocation12], 128  }
0x12ee   :  { %1222 = vsyncadd [#allocation12], 4294967168 }
0x12ef   :  { %942 = vsyncpa [#allocation5], 1 }
0x12f0   :  { %943 = vsyncpa [#allocation8], 1 }
0x12f1   :  { %944 = vsyncpa [#allocation6], 1 }
0x12f2   :  { %945 = vsyncpa [#allocation12], 1 }

</bundles_post_ra>
